<compile_context>
chip_gen: v7x
topology: tpu7x:2x2x1
jax: 0.10.0
libtpu: 0.0.40
codegen_flags: <defaults>
</compile_context>

<pallas_src>
import math
from typing import NamedTuple

import jax
import jax.numpy as jnp
import numpy as np
from jax.experimental import pallas as pl
from jax.experimental.pallas import tpu as pltpu

HIDDEN = 32
NUM_HEADS = 4
HEAD_DIM = HIDDEN // NUM_HEADS
LN_EPS = 1e-5          # torch.nn.LayerNorm default
LANES = 128
PACK = LANES // HIDDEN  # tokens packed per 128-lane row (4 for H=32)


def _layernorm(x, gamma, beta):
    # PyTorch LayerNorm: biased variance over last dim, eps inside rsqrt.
    mu = jnp.mean(x, axis=-1, keepdims=True)
    var = jnp.mean((x - mu) ** 2, axis=-1, keepdims=True)
    return (x - mu) * jax.lax.rsqrt(var + LN_EPS) * gamma + beta


# --------------------------------------------------------------------------
# Production kernel: FFN only (this is what MultiQueryAttention.forward returns).
# Lane-dense packed layout: each (TILE, 128) row holds PACK tokens of width H.
# --------------------------------------------------------------------------
def _ffn_packed_kernel(x_ref, wmats_ref, vecs_ref, out_ref):
    x = x_ref[...]                    # (TILE, 128) f32, PACK tokens per row
    w1bd = wmats_ref[0]               # (128,128) block-diag replicas of W1^T
    w2bd = wmats_ref[1]               # (128,128) block-diag replicas of W2^T
    mseg = wmats_ref[2]               # (128,128) per-H-lane-segment mean matrix
    vecs = vecs_ref[...]              # (4, 128): b1, b2, ln gamma, ln beta (tiled)
    b1, b2, gamma, beta = vecs[0:1], vecs[1:2], vecs[2:3], vecs[3:4]

    # NOTE: matmuls kept in f32 for exact parity with the f32 reference at this
    # tiny H; for larger H cast activations/weights to bf16 (MXU-native) and
    # keep preferred_element_type=f32.
    h1 = jnp.maximum(jnp.dot(x, w1bd, preferred_element_type=jnp.float32) + b1, 0.0)
    y = x + jnp.dot(h1, w2bd, preferred_element_type=jnp.float32) + b2
    # LayerNorm per 32-lane token segment, done as block-diagonal MXU matmuls
    # (mean and biased variance), keeping everything lane-dense.
    mu = jnp.dot(y, mseg, preferred_element_type=jnp.float32)
    d = y - mu
    var = jnp.dot(d * d, mseg, preferred_element_type=jnp.float32)
    out_ref[...] = d * jax.lax.rsqrt(var + LN_EPS) * gamma + beta


def _replicated_spec(arr):
    return pl.BlockSpec(arr.shape, lambda i, _nd=arr.ndim: (0,) * _nd)


def _choose_tiling(n_pack_rows):
    """Pick (tile_rows, grid) in packed-row units (row = 128 lanes = PACK tokens)."""
    tile = 1024                                       # 1024x128 f32 block = 512 KiB
    while tile > 8 and (n_pack_rows + tile - 1) // tile < 8:
        tile //= 2                                    # aim for >=8 pipelined steps
    tile = max(tile, 8)                               # (8,128) layout minimum
    grid = (n_pack_rows + tile - 1) // tile
    if grid > 1 and grid % 2 == 1:
        grid += 1                                     # even split across v7x's 2 TCs
    return tile, grid


def _ffn_operands(params):
    """Pack all replicated FFN operands into two lane-dense arrays (wrapper-side)."""
    eye = jnp.eye(PACK, dtype=jnp.float32)
    w1bd = jnp.kron(eye, params["W1"].T.astype(jnp.float32))              # (128,128)
    w2bd = jnp.kron(eye, params["W2"].T.astype(jnp.float32))              # (128,128)
    mseg = jnp.kron(eye, jnp.full((HIDDEN, HIDDEN), 1.0 / HIDDEN, jnp.float32))
    wmats = jnp.stack([w1bd, w2bd, mseg])                                 # (3,128,128)
    vecs = jnp.concatenate(
        [jnp.tile(params["b1"], (1, PACK)), jnp.tile(params["b2"], (1, PACK)),
         jnp.tile(params["fln_g"], (1, PACK)), jnp.tile(params["fln_b"], (1, PACK))],
        axis=0)                                                           # (4,128)
    return wmats, vecs


def ffn_pallas(x, params):
    """FFN(x) = LN(x + fc2(relu(fc1(x)))) -- the module's actual return value."""
    B, S, H = x.shape
    # TODO(synk): lane-packing assumes 128 % H == 0; for other H fall back to an
    # unpacked (TILE_ROWS, H) row-tiled kernel.
    assert H == HIDDEN and LANES % H == 0
    n_tok = B * S
    n_pack = -(-n_tok // PACK)
    tile, grid = _choose_tiling(n_pack)
    pad_rows = grid * tile
    pad_tok = pad_rows * PACK - n_tok

    # Wrapper-side flatten + lane packing: (B,S,H) -> (B*S,H) -> (rows,128).
    # All reshapes stay out of the kernel (free metadata, no VMEM relayouts).
    x2 = x.reshape(n_tok, H).astype(jnp.float32)
    if pad_tok:
        x2 = jnp.pad(x2, ((0, pad_tok), (0, 0)))
    xp = x2.reshape(pad_rows, LANES)

    wmats, vecs = _ffn_operands(params)

    # Explicit VMEM budget: in+out double-buffered blocks, replicated operands,
    # kernel temporaries, plus headroom.  Capped well under v7x's 64 MiB.
    blk_bytes = tile * LANES * 4
    vmem_bytes = (2 * 2 * blk_bytes
                  + 2 * int(wmats.size + vecs.size) * 4
                  + 6 * blk_bytes
                  + (2 << 20))
    vmem_bytes = int(min(max(vmem_bytes, 16 << 20), 32 << 20))

    out_p = pl.pallas_call(
        _ffn_packed_kernel,
        grid=(grid,),
        in_specs=[pl.BlockSpec((tile, LANES), lambda i: (i, 0)),
                  _replicated_spec(wmats),
                  _replicated_spec(vecs)],
        out_specs=pl.BlockSpec((tile, LANES), lambda i: (i, 0)),
        out_shape=jax.ShapeDtypeStruct((pad_rows, LANES), jnp.float32),
        compiler_params=pltpu.CompilerParams(
            dimension_semantics=("parallel",),
            vmem_limit_bytes=vmem_bytes),
    )(xp, wmats, vecs)

    return out_p.reshape(pad_rows * PACK, H)[:n_tok].reshape(B, S, H)


def multi_query_attention(x, params):
    """Matches MultiQueryAttention.forward(hidden_state): returns ffn(hidden_state)."""
    return ffn_pallas(x, params)


# --------------------------------------------------------------------------
# Verification-only kernel: also computes the (discarded) attention branch.
# Kept off the hot path; left simple / per-batch since it never runs in prod.
# --------------------------------------------------------------------------
def _mqa_verify_kernel(
    x_ref,
    wqkv_t_ref, bqkv_ref, wot_ref, bo_ref, lng_ref, lnb_ref,
    w1t_ref, b1_ref, w2t_ref, b2_ref, flng_ref, flnb_ref,
    attn_out_ref, ffn_out_ref,
):
    x = x_ref[0]                                  # (S, H) tile for this batch element
    S, H = x.shape
    nh, hd = NUM_HEADS, HEAD_DIM

    # Fused QKV projection: one MXU push instead of three.
    qkv = jnp.dot(x, wqkv_t_ref[...], preferred_element_type=jnp.float32) + bqkv_ref[...]
    q = qkv[:, :H]                                # (S, H)
    k = qkv[:, H:H + hd]                          # (S, hd)
    v = qkv[:, H + hd:H + 2 * hd]                 # (S, hd)

    # Head-major query rows: q2[n*S + s, :] = q[s, n*hd:(n+1)*hd].
    # TODO(synk): for heavy verification use, replace this per-head lane-slice
    # concatenate with a head-batched dot_general / block-diagonal fold and
    # batch several batch elements per grid step (M >= 128 on the MXU).
    q2 = jnp.concatenate([q[:, n * hd:(n + 1) * hd] for n in range(nh)], axis=0)  # (nh*S, hd)

    inv_scale = 1.0 / math.sqrt(hd)
    scores = jax.lax.dot_general(
        q2, k, (((1,), (1,)), ((), ())),
        preferred_element_type=jnp.float32) * inv_scale                            # (nh*S, S)
    scores = scores - jnp.max(scores, axis=-1, keepdims=True)
    p = jnp.exp(scores)
    # Exact divide (not the approx EUP reciprocal): verification wants tight tolerance.
    p = p / jnp.sum(p, axis=-1, keepdims=True)
    ctx = jnp.dot(p, v, preferred_element_type=jnp.float32)                        # (nh*S, hd)

    # Reproduce reference's buggy `output.transpose(-1,-2).contiguous().view(B,-1,H)`:
    # (nh, S, hd) -> (nh, hd, S) -> row-major flatten -> (S, H).
    attn_ctx = (jnp.transpose(ctx.reshape(nh, S, hd), (0, 2, 1))
                .reshape(nh * hd, S)
                .reshape(S, H))

    o = jnp.dot(attn_ctx, wot_ref[...], preferred_element_type=jnp.float32) + bo_ref[...]
    attn_out_ref[0] = _layernorm(o + x, lng_ref[...], lnb_ref[...])
    # TODO(synk): attention_mask (optional arg) not plumbed; reference default path is mask=None.
    # TODO(synk): for realistic S (>~1K) the (nh*S, S) score tile needs flash-style
    # online-softmax tiling over K blocks to fit v7x's 64 MiB VMEM.

    # FFN branch (same math as the production kernel) for side-by-side checking.
    h1 = jnp.maximum(
        jnp.dot(x, w1t_ref[...], preferred_element_type=jnp.float32) + b1_ref[...], 0.0)
    h2 = jnp.dot(h1, w2t_ref[...], preferred_element_type=jnp.float32) + b2_ref[...]
    ffn_out_ref[0] = _layernorm(x + h2, flng_ref[...], flnb_ref[...])


class MQAOutputs(NamedTuple):
    ffn: jax.Array   # what the PyTorch module returns
    attn: jax.Array  # the (discarded) attention branch, for verification only


def mqa_verify_pallas(x, params):
    """Dual-output kernel used ONLY for verification (the attention branch is
    dead code in the PyTorch module's forward, so it is kept off the hot path)."""
    B, S, H = x.shape

    wqkv_t = jnp.concatenate([params["Wq"], params["Wk"], params["Wv"]], axis=0).T  # (H, H+2hd)
    bqkv = jnp.concatenate([params["bq"], params["bk"], params["bv"]], axis=1)      # (1, H+2hd)
    weights = [wqkv_t, bqkv, params["Wo"].T, params["bo"], params["ln_g"], params["ln_b"],
               params["W1"].T, params["b1"], params["W2"].T, params["b2"],
               params["fln_g"], params["fln_b"]]

    in_specs = [pl.BlockSpec((1, S, H), lambda b: (b, 0, 0))]
    in_specs += [_replicated_spec(w) for w in weights]
    out_spec = pl.BlockSpec((1, S, H), lambda b: (b, 0, 0))

    attn_out, ffn_out = pl.pallas_call(
        _mqa_verify_kernel,
        grid=(B,),
        in_specs=in_specs,
        out_specs=(out_spec, out_spec),
        out_shape=(jax.ShapeDtypeStruct((B, S, H), jnp.float32),
                   jax.ShapeDtypeStruct((B, S, H), jnp.float32)),
        compiler_params=pltpu.CompilerParams(dimension_semantics=("parallel",)),
    )(x, *weights)
    return MQAOutputs(ffn=ffn_out, attn=attn_out)


# ----------------------- deterministic parameter init -----------------------
def init_params(key, hidden=HIDDEN, num_heads=NUM_HEADS):
    hd = hidden // num_heads

    def linear(k, out_f, in_f):
        kw, kb = jax.random.split(k)
        bound = 1.0 / math.sqrt(in_f)
        w = jax.random.uniform(kw, (out_f, in_f), jnp.float32, -bound, bound)
        b = jax.random.uniform(kb, (1, out_f), jnp.float32, -bound, bound)
        return w, b

    ks = jax.random.split(key, 6)
    Wq, bq = linear(ks[0], hidden, hidden)
    Wk, bk = linear(ks[1], hd, hidden)
    Wv, bv = linear(ks[2], hd, hidden)
    Wo, bo = linear(ks[3], hidden, hidden)
    W1, b1 = linear(ks[4], hidden, hidden)
    W2, b2 = linear(ks[5], hidden, hidden)
    ones = jnp.ones((1, hidden), jnp.float32)
    zeros = jnp.zeros((1, hidden), jnp.float32)
    return dict(Wq=Wq, bq=bq, Wk=Wk, bk=bk, Wv=Wv, bv=bv, Wo=Wo, bo=bo,
                ln_g=ones, ln_b=zeros,
                W1=W1, b1=b1, W2=W2, b2=b2, fln_g=ones, fln_b=zeros)


# ----------------------- pure-JAX reference (mirrors PyTorch f32) ------------
def reference_forward(x, p):
    with jax.default_matmul_precision("highest"):   # match f32 PyTorch semantics
        B, S, H = x.shape
        q = x @ p["Wq"].T + p["bq"]
        k = x @ p["Wk"].T + p["bk"]
        v = x @ p["Wv"].T + p["bv"]
        qh = jnp.transpose(q.reshape(B, S, NUM_HEADS, HEAD_DIM), (0, 2, 1, 3))   # (B,nh,S,hd)
        kh = jnp.transpose(k.reshape(B, S, 1, HEAD_DIM), (0, 2, 1, 3))           # (B,1,S,hd)
        vh = jnp.transpose(v.reshape(B, S, 1, HEAD_DIM), (0, 2, 1, 3))
        scores = jnp.matmul(qh, jnp.swapaxes(kh, -1, -2)) / math.sqrt(HEAD_DIM)  # (B,nh,S,S)
        probs = jax.nn.softmax(scores, axis=-1)
        out = jnp.matmul(probs, vh)                                              # (B,nh,S,hd)
        out = jnp.swapaxes(out, -1, -2).reshape(B, -1, HEAD_DIM * NUM_HEADS)     # buggy view
        attn = _layernorm(out @ p["Wo"].T + p["bo"] + x, p["ln_g"], p["ln_b"])
        h1 = jnp.maximum(x @ p["W1"].T + p["b1"], 0.0)
        h2 = h1 @ p["W2"].T + p["b2"]
        ffn = _layernorm(x + h2, p["fln_g"], p["fln_b"])
        return ffn, attn


if __name__ == "__main__":
    key = jax.random.PRNGKey(0)
    kx, kp = jax.random.split(key)
    params = init_params(kp)

    # Production path (exactly what the PyTorch module's forward returns).
    # Multiple shapes exercise the padded tile and multi-step pipelined grid.
    for (B, S) in [(2, 8), (3, 7), (4, 512)]:
        xs = jax.random.normal(jax.random.fold_in(kx, 131 * S + B), (B, S, HIDDEN), jnp.float32)
        out = multi_query_attention(xs, params)
        jax.block_until_ready(out)
        ref_ffn, _ = reference_forward(xs, params)
        assert out.shape == (B, S, HIDDEN)
        np.testing.assert_allclose(np.asarray(out), np.asarray(ref_ffn), atol=1e-4, rtol=1e-4)

    # Verification-only dual-output kernel (includes the discarded attention branch).
    B, S = 2, 8
    x = jax.random.normal(kx, (B, S, HIDDEN), jnp.float32)
    ver = mqa_verify_pallas(x, params)
    jax.block_until_ready(ver)
    ref_ffn, ref_attn = reference_forward(x, params)
    np.testing.assert_allclose(np.asarray(ver.ffn), np.asarray(ref_ffn), atol=1e-4, rtol=1e-4)
    np.testing.assert_allclose(np.asarray(ver.attn), np.asarray(ref_attn), atol=1e-4, rtol=1e-4)

    print("KERNEL_OK")
</pallas_src>

<mosaic_0001>
module attributes {stable_mosaic.version = 11 : i64} {
  func.func @_ffn_packed_kernel(%arg0: i32, %arg1: memref<8x128xf32, #tpu.memory_space<vmem>>, %arg2: memref<3x128x128xf32, #tpu.memory_space<vmem>>, %arg3: memref<4x128xf32, #tpu.memory_space<vmem>>, %arg4: memref<8x128xf32, #tpu.memory_space<vmem>>) attributes {dimension_semantics = [#tpu.dimension_semantics<parallel>], iteration_bounds = array<i64: 1>, scalar_prefetch = 0 : i64, scratch_operands = 0 : i64, tpu.core_type = #tpu.core_type<tc>, window_params = [{transform_indices = @transform_0, window_bounds = array<i64: 8, 128>}, {pipeline_mode = #tpu.pipeline_mode<synchronous>, transform_indices = @transform_1, window_bounds = array<i64: 3, 128, 128>}, {pipeline_mode = #tpu.pipeline_mode<synchronous>, transform_indices = @transform_2, window_bounds = array<i64: 4, 128>}, {transform_indices = @transform_3, window_bounds = array<i64: 8, 128>}]} {
    %c0 = arith.constant 0 : index
    %c0_0 = arith.constant 0 : index
    %0 = vector.load %arg1[%c0, %c0_0] : memref<8x128xf32, #tpu.memory_space<vmem>>, vector<8x128xf32>
    %c0_1 = arith.constant 0 : index
    %c0_2 = arith.constant 0 : index
    %c0_3 = arith.constant 0 : index
    %1 = vector.load %arg2[%c0_1, %c0_2, %c0_3] : memref<3x128x128xf32, #tpu.memory_space<vmem>>, vector<1x128x128xf32>
    %2 = vector.shape_cast %1 : vector<1x128x128xf32> to vector<128x128xf32>
    %c1 = arith.constant 1 : index
    %c0_4 = arith.constant 0 : index
    %c0_5 = arith.constant 0 : index
    %3 = vector.load %arg2[%c1, %c0_4, %c0_5] : memref<3x128x128xf32, #tpu.memory_space<vmem>>, vector<1x128x128xf32>
    %4 = vector.shape_cast %3 : vector<1x128x128xf32> to vector<128x128xf32>
    %c2 = arith.constant 2 : index
    %c0_6 = arith.constant 0 : index
    %c0_7 = arith.constant 0 : index
    %5 = vector.load %arg2[%c2, %c0_6, %c0_7] : memref<3x128x128xf32, #tpu.memory_space<vmem>>, vector<1x128x128xf32>
    %6 = vector.shape_cast %5 : vector<1x128x128xf32> to vector<128x128xf32>
    %c0_8 = arith.constant 0 : index
    %c0_9 = arith.constant 0 : index
    %7 = vector.load %arg3[%c0_8, %c0_9] : memref<4x128xf32, #tpu.memory_space<vmem>>, vector<4x128xf32>
    %8 = vector.extract_strided_slice %7 {offsets = [0, 0], sizes = [1, 128], strides = [1, 1]} : vector<4x128xf32> to vector<1x128xf32>
    %9 = vector.extract_strided_slice %7 {offsets = [1, 0], sizes = [1, 128], strides = [1, 1]} : vector<4x128xf32> to vector<1x128xf32>
    %10 = vector.extract_strided_slice %7 {offsets = [2, 0], sizes = [1, 128], strides = [1, 1]} : vector<4x128xf32> to vector<1x128xf32>
    %11 = vector.extract_strided_slice %7 {offsets = [3, 0], sizes = [1, 128], strides = [1, 1]} : vector<4x128xf32> to vector<1x128xf32>
    %cst = arith.constant dense<0.000000e+00> : vector<8x128xf32>
    %12 = tpu.matmul %0, %2, %cst {dimension_numbers = #tpu.dot_dimension_numbers<[1], [0], [0], [1], [0, 0, 1, 1], [], []>} : vector<8x128xf32>, vector<128x128xf32>, vector<8x128xf32> -> vector<8x128xf32>
    %13 = vector.broadcast %8 : vector<1x128xf32> to vector<8x128xf32>
    %14 = arith.addf %12, %13 : vector<8x128xf32>
    %cst_10 = arith.constant 0.000000e+00 : f32
    %15 = vector.broadcast %cst_10 : f32 to vector<8x128xf32>
    %16 = arith.maximumf %14, %15 : vector<8x128xf32>
    %cst_11 = arith.constant dense<0.000000e+00> : vector<8x128xf32>
    %17 = tpu.matmul %16, %4, %cst_11 {dimension_numbers = #tpu.dot_dimension_numbers<[1], [0], [0], [1], [0, 0, 1, 1], [], []>} : vector<8x128xf32>, vector<128x128xf32>, vector<8x128xf32> -> vector<8x128xf32>
    %18 = arith.addf %0, %17 : vector<8x128xf32>
    %19 = vector.broadcast %9 : vector<1x128xf32> to vector<8x128xf32>
    %20 = arith.addf %18, %19 : vector<8x128xf32>
    %cst_12 = arith.constant dense<0.000000e+00> : vector<8x128xf32>
    %21 = tpu.matmul %20, %6, %cst_12 {dimension_numbers = #tpu.dot_dimension_numbers<[1], [0], [0], [1], [0, 0, 1, 1], [], []>} : vector<8x128xf32>, vector<128x128xf32>, vector<8x128xf32> -> vector<8x128xf32>
    %22 = arith.subf %20, %21 : vector<8x128xf32>
    %23 = arith.mulf %22, %22 : vector<8x128xf32>
    %cst_13 = arith.constant dense<0.000000e+00> : vector<8x128xf32>
    %24 = tpu.matmul %23, %6, %cst_13 {dimension_numbers = #tpu.dot_dimension_numbers<[1], [0], [0], [1], [0, 0, 1, 1], [], []>} : vector<8x128xf32>, vector<128x128xf32>, vector<8x128xf32> -> vector<8x128xf32>
    %cst_14 = arith.constant 9.99999974E-6 : f32
    %25 = vector.broadcast %cst_14 : f32 to vector<8x128xf32>
    %26 = arith.addf %24, %25 : vector<8x128xf32>
    %27 = math.rsqrt %26 : vector<8x128xf32>
    %28 = arith.mulf %22, %27 : vector<8x128xf32>
    %29 = vector.broadcast %10 : vector<1x128xf32> to vector<8x128xf32>
    %30 = arith.mulf %28, %29 : vector<8x128xf32>
    %31 = vector.broadcast %11 : vector<1x128xf32> to vector<8x128xf32>
    %32 = arith.addf %30, %31 : vector<8x128xf32>
    %c0_15 = arith.constant 0 : index
    %c0_16 = arith.constant 0 : index
    %33 = vector.load %arg4[%c0_15, %c0_16] : memref<8x128xf32, #tpu.memory_space<vmem>>, vector<8x128xf32>
    tpu.vector_store %arg4[%c0_15, %c0_16], %32 {strides = array<i32>} : memref<8x128xf32, #tpu.memory_space<vmem>>, vector<8x128xf32>,
    return
  }
  func.func @transform_0(%arg0: i32) -> (i32, i32) {
    %c0_i32 = arith.constant 0 : i32
    %c0_i32_0 = arith.constant 0 : i32
    return %arg0, %c0_i32 : i32, i32
  }
  func.func @transform_1(%arg0: i32) -> (i32, i32, i32) {
    %c0_i32 = arith.constant 0 : i32
    %c0_i32_0 = arith.constant 0 : i32
    %c0_i32_1 = arith.constant 0 : i32
    %c0_i32_2 = arith.constant 0 : i32
    return %c0_i32, %c0_i32_0, %c0_i32_1 : i32, i32, i32
  }
  func.func @transform_2(%arg0: i32) -> (i32, i32) {
    %c0_i32 = arith.constant 0 : i32
    %c0_i32_0 = arith.constant 0 : i32
    %c0_i32_1 = arith.constant 0 : i32
    return %c0_i32, %c0_i32_0 : i32, i32
  }
  func.func @transform_3(%arg0: i32) -> (i32, i32) {
    %c0_i32 = arith.constant 0 : i32
    %c0_i32_0 = arith.constant 0 : i32
    return %arg0, %c0_i32 : i32, i32
  }
}

</mosaic_0001>

<bundles_post_ra>
// kernel: tpu_custom_call.1
= control target key start
LH: loop header
LB: loop body
LE: loop exit
PB: predicated region body
PF: predicated region fallthrough
CT: control target
= control target key end

     0   :  { %8 = vsyncpa [#allocation3], 0  ;;  %s919_s0 = inlined_call_operand.hbm [shape: f32[8,128], index: 0, kind: input, shape index: {}]   ;;  %s920_s1 = inlined_call_operand.hbm [shape: f32[3,128,128], index: 1, kind: input, shape index: {}]   ;;  %s921_s2 = inlined_call_operand.vmem [shape: f32[4,128], index: 2, kind: input, shape index: {}]   ;;  %s922_s3 = inlined_call_operand.hbm [shape: f32[8,128], index: 3, kind: output, shape index: {}]  }
   0x1   :  { %9 = vsyncpa [#allocation6], 0 }
   0x2   :  { %10 = vsyncpa [#allocation4], 0  ;;  %s801_s12 = smov [#allocation2]   ;;  %s802_s14 = smov [#allocation5]  }
   0x3   :  { %s17_s13 = sshll.u32 %s801_s12, 4  ;;  %s26_s15 = sshll.u32 %s802_s14, 4  ;;  %s18_s13 = int_to_ptr.vmem [resolvable:$true] %s17_s13  ;;  %s829_s15 = int_to_ptr.vmem [resolvable:$true] %s26_s15 }
   0x4   :  { %s729_s18 = scalar_lea.hbm %s919_s0, 128 }
   0x5   :  { %p730_p0 = scmp.ne.s32.totalorder %s919_s0, %s729_s18  ;;  %p733_p1 = scmp.lt.u32.totalorder %s729_s18, %s919_s0 }
   0x7   :  { %p735_p2 = pnand %p733_p1, %p730_p0 }
   0x9   :  { %738 = shalt.err (!%p735_p2)
}
   0xa   :  { %s739_s23 = scalar_lea.vmem %s18_s13, 128  ;;  %p744_p4 = scmp.lt.s32.totalorder %s18_s13, %s18_s13 }
   0xb   :  { %p740_p3 = scmp.ne.s32.totalorder %s18_s13, %s739_s23  ;;  %p745_p5 = scmp.lt.s32.totalorder %s739_s23, %s739_s23 }
   0xd   :  { %p746_p6 = por %p745_p5, %p744_p4 }
   0xf   :  { %p747_p7 = pnand %p746_p6, %p740_p3 }
  0x11   :  { %750 = shalt.err (!%p747_p7)
}
  0x12   :  { %20 = dma.hbm_to_vmem [thread:$0]  %s919_s0, 128, %s18_s13, [#allocation3]  }
  0x13   :  { %s751_s28 = scalar_lea.hbm %s920_s1, 6144 }
  0x14   :  { %p752_p8 = scmp.ne.s32.totalorder %s920_s1, %s751_s28  ;;  %p755_p9 = scmp.lt.u32.totalorder %s751_s28, %s920_s1 }
  0x16   :  { %p757_p10 = pnand %p755_p9, %p752_p8 }
  0x18   :  { %760 = shalt.err (!%p757_p10)
}
  0x19   :  { %s761_s6 = scalar_lea.vmem %s829_s15, 6144  ;;  %p766_p12 = scmp.lt.s32.totalorder %s829_s15, %s829_s15 }
  0x1a   :  { %p762_p11 = scmp.ne.s32.totalorder %s829_s15, %s761_s6  ;;  %p767_p13 = scmp.lt.s32.totalorder %s761_s6, %s761_s6 }
  0x1c   :  { %p768_p0 = por %p767_p13, %p766_p12 }
  0x1e   :  { %p769_p1 = pnand %p768_p0, %p762_p11 }
  0x20   :  { %772 = shalt.err (!%p769_p1)
}
  0x21   :  { %s803_s0 = smov 128   ;;  %s804_s7 = smov 8  }
  0x22   :  { %32 = dma.hbm_to_vmem [thread:$0]  %s920_s1, 6144, %s829_s15, [#allocation6], %s803_s0, %s803_s0, %s804_s7  }
  0x23   :  { %795 = dma.done.wait [#allocation3], 128  }
  0x24   :  { %796 = vsyncadd [#allocation3], 4294967168 }
  0x25   :  { %797 = dma.done.wait [#allocation6], 6144  }
  0x26   :  { %798 = vsyncadd [#allocation6], 4294961152  ;;  %v805_v0 = vmov 0.0|0.0   ;;  %vm806_vm0 = vmmov 0   ;;  %v807_v1 = vmov 0.0   ;;  %v42_v2 = vld [vmem:[#allocation5] sm:$0xff] }
  0x27   :  { %623 = vmatprep.subr.bf16.mxu0 %v805_v0  ;;  %515 = vmatprep.mubr.msk.f32.mxu0 %vm806_vm0, %v807_v1  ;;  %v43_v3 = vld [vmem:[#allocation5 + $0x8] sm:$0xff]  ;;  %v44_v4 = vld [vmem:[#allocation5 + $0x10] sm:$0xff]  ;;  %v45_v6 = vld [vmem:[#allocation5 + $0x18] sm:$0xff] }
  0x28   :  { %647 = vmatprep.subr.bf16.mxu1 %v805_v0  ;;  %550 = vmatprep.mubr.msk.f32.mxu1 %vm806_vm0, %v807_v1  ;;  %v624_v5 = vpack.c.bf16 %v43_v3, %v42_v2  ;;  %v627_v7 = vpack.c.bf16 %v45_v6, %v44_v4  ;;  %v46_v8 = vld [vmem:[#allocation5 + $0x20] sm:$0xff]  ;;  %v47_v9 = vld [vmem:[#allocation5 + $0x28] sm:$0xff]  ;;  %v61_v12 = vld [vmem:[#allocation5 + $0x90] sm:$0xff] }
  0x29   :  { %v59_v10 = vld [vmem:[#allocation5 + $0x80] sm:$0xff]  ;;  %v60_v11 = vld [vmem:[#allocation5 + $0x88] sm:$0xff]  ;;  %v62_v13 = vld [vmem:[#allocation5 + $0x98] sm:$0xff]  ;;  %v630_v14 = vpack.c.bf16 %v47_v9, %v46_v8 }
  0x2a   :  { %625 = vmatpush3.bf16.msra.mxu0 %v624_v5  ;;  %v648_v15 = vpack.c.bf16 %v60_v11, %v59_v10  ;;  %v48_v16 = vld [vmem:[#allocation5 + $0x30] sm:$0xff]  ;;  %v49_v17 = vld [vmem:[#allocation5 + $0x38] sm:$0xff]  ;;  %v651_v18 = vpack.c.bf16 %v62_v13, %v61_v12  ;;  %v63_v19 = vld [vmem:[#allocation5 + $0xa0] sm:$0xff]  ;;  %v93_v10 = vlaneseq }
  0x2b   :  { %626 = vmatprep.subr.bf16.mxu0 %v805_v0  ;;  %v64_v20 = vld [vmem:[#allocation5 + $0xa8] sm:$0xff]  ;;  %v633_v21 = vpack.c.bf16 %v49_v17, %v48_v16  ;;  %v50_v22 = vld [vmem:[#allocation5 + $0x40] sm:$0xff]  ;;  %v65_v25 = vld [vmem:[#allocation5 + $0xb0] sm:$0xff] }
  0x2c   :  { %649 = vmatpush3.bf16.msra.mxu1 %v648_v15  ;;  %v51_v23 = vld [vmem:[#allocation5 + $0x48] sm:$0xff]  ;;  %v654_v24 = vpack.c.bf16 %v64_v20, %v63_v19  ;;  %v66_v26 = vld [vmem:[#allocation5 + $0xb8] sm:$0xff]  ;;  %v52_v28 = vld [vmem:[#allocation5 + $0x50] sm:$0xff]  ;;  %v94_v11 = vshrl.u32 %v93_v10, 7 }
  0x2d   :  { %650 = vmatprep.subr.bf16.mxu1 %v805_v0  ;;  %v636_v27 = vpack.c.bf16 %v51_v23, %v50_v22  ;;  %v53_v29 = vld [vmem:[#allocation5 + $0x58] sm:$0xff]  ;;  %v657_v30 = vpack.c.bf16 %v66_v26, %v65_v25  ;;  %v67_v31 = vld [vmem:[#allocation5 + $0xc0] sm:$0xff]  ;;  %v68_v32 = vld [vmem:[#allocation5 + $0xc8] sm:$0xff] }
  0x2e   :  { %628 = vmatpush3.bf16.msra.mxu0 %v627_v7  ;;  %v639_v33 = vpack.c.bf16 %v53_v29, %v52_v28  ;;  %v54_v34 = vld [vmem:[#allocation5 + $0x60] sm:$0xff]  ;;  %v55_v35 = vld [vmem:[#allocation5 + $0x68] sm:$0xff]  ;;  %v660_v36 = vpack.c.bf16 %v68_v32, %v67_v31  ;;  %v69_v37 = vld [vmem:[#allocation5 + $0xd0] sm:$0xff]  ;;  %v95_v12 = vsub.s32 0, %v94_v11 }
  0x2f   :  { %629 = vmatprep.subr.bf16.mxu0 %v805_v0  ;;  %v70_v38 = vld [vmem:[#allocation5 + $0xd8] sm:$0xff]  ;;  %v642_v39 = vpack.c.bf16 %v55_v35, %v54_v34  ;;  %v56_v40 = vld [vmem:[#allocation5 + $0x70] sm:$0xff]  ;;  %v71_v43 = vld [vmem:[#allocation5 + $0xe0] sm:$0xff]  ;;  %v395_v34 = vsub.s32 3, %v94_v11 }
  0x30   :  { %652 = vmatpush3.bf16.msra.mxu1 %v651_v18  ;;  %v57_v41 = vld [vmem:[#allocation5 + $0x78] sm:$0xff]  ;;  %v663_v42 = vpack.c.bf16 %v70_v38, %v69_v37  ;;  %v72_v44 = vld [vmem:[#allocation5 + $0xe8] sm:$0xff]  ;;  %v73_v48 = vld [vmem:[#allocation5 + $0xf0] sm:$0xff] }
  0x31   :  { %653 = vmatprep.subr.bf16.mxu1 %v805_v0  ;;  %v645_v45 = vpack.c.bf16 %v57_v41, %v56_v40  ;;  %v666_v46 = vpack.c.bf16 %v72_v44, %v71_v43  ;;  %v879_v47 = vld [vmem:[#allocation2] sm:$0xff]  ;;  %v76_v51 = vld [vmem:[#allocation5 + $0x100] sm:$0xff]  ;;  %v77_v52 = vld [vmem:[#allocation5 + $0x108] sm:$0xff] }
  0x32   :  { %631 = vmatpush3.bf16.msra.mxu0 %v630_v14  ;;  %v74_v49 = vld [vmem:[#allocation5 + $0xf8] sm:$0xff]  ;;  %v78_v53 = vld [vmem:[#allocation5 + $0x110] sm:$0xff]  ;;  %v672_v54 = vpack.c.bf16 %v77_v52, %v76_v51  ;;  %v80_v57 = vld [vmem:[#allocation5 + $0x120] sm:$0xff] }
  0x33   :  { %632 = vmatprep.subr.bf16.mxu0 %v805_v0  ;;  %v669_v50 = vpack.c.bf16 %v74_v49, %v73_v48  ;;  %v79_v55 = vld [vmem:[#allocation5 + $0x118] sm:$0xff]  ;;  %v81_v58 = vld [vmem:[#allocation5 + $0x128] sm:$0xff]  ;;  %v82_v60 = vld [vmem:[#allocation5 + $0x130] sm:$0xff] }
  0x34   :  { %655 = vmatpush3.bf16.msra.mxu1 %v654_v24  ;;  %v675_v56 = vpack.c.bf16 %v79_v55, %v78_v53  ;;  %v678_v59 = vpack.c.bf16 %v81_v58, %v80_v57  ;;  %v83_v61 = vld [vmem:[#allocation5 + $0x138] sm:$0xff]  ;;  %v84_v63 = vld [vmem:[#allocation5 + $0x140] sm:$0xff]  ;;  %v85_v2 = vld [vmem:[#allocation5 + $0x148] sm:$0xff] }
  0x35   :  { %656 = vmatprep.subr.bf16.mxu1 %v805_v0  ;;  %v681_v62 = vpack.c.bf16 %v83_v61, %v82_v60  ;;  %v684_v3 = vpack.c.bf16 %v85_v2, %v84_v63  ;;  %v86_v4 = vld [vmem:[#allocation5 + $0x150] sm:$0xff]  ;;  %v87_v5 = vld [vmem:[#allocation5 + $0x158] sm:$0xff]  ;;  %v88_v7 = vld [vmem:[#allocation5 + $0x160] sm:$0xff] }
  0x36   :  { %634 = vmatpush3.bf16.msra.mxu0 %v633_v21  ;;  %v687_v6 = vpack.c.bf16 %v87_v5, %v86_v4  ;;  %v89_v8 = vld [vmem:[#allocation5 + $0x168] sm:$0xff]  ;;  %v92_v13 = vld [vmem:[%s921_s2] sm:$0xf]  ;;  %v241_v21 = vsub.s32 1, %v94_v11  ;;  %s808_s2 = smov [#allocation7]  }
  0x37   :  { %635 = vmatprep.subr.bf16.mxu0 %v805_v0  ;;  %v690_v9 = vpack.c.bf16 %v89_v8, %v88_v7  ;;  %v96_v14 = vrot.slane %v92_v13, %v95_v12  ;;  %v91_v19 = vld [vmem:[#allocation5 + $0x178] sm:$0xff]  ;;  %v396_v38 = vrot.slane %v92_v13, %v395_v34  ;;  %s405_s11 = sshll.u32 %s808_s2, 4  ;;  %s406_s11 = int_to_ptr.vmem [resolvable:$true] %s405_s11 }
  0x38   :  { %658 = vmatpush3.bf16.msra.mxu1 %v657_v30  ;;  %v242_v22 = vrot.slane %v92_v13, %v241_v21  ;;  %s773_s12 = scalar_lea.vmem %s406_s11, 128  ;;  %p778_p3 = scmp.lt.s32.totalorder %s406_s11, %s406_s11 }
  0x39   :  { %659 = vmatprep.subr.bf16.mxu1 %v805_v0  ;;  %p774_p2 = scmp.ne.s32.totalorder %s406_s11, %s773_s12  ;;  %p779_p4 = scmp.lt.s32.totalorder %s773_s12, %s773_s12 }
  0x3a   :  { %637 = vmatpush3.bf16.msra.mxu0 %v636_v27 }
  0x3b   :  { %638 = vmatprep.subr.bf16.mxu0 %v805_v0  ;;  %p780_p5 = por %p779_p4, %p778_p3 }
  0x3c   :  { %661 = vmatpush3.bf16.msra.mxu1 %v660_v36 }
  0x3d   :  { %662 = vmatprep.subr.bf16.mxu1 %v805_v0  ;;  %p781_p6 = pnand %p780_p5, %p774_p2 }
  0x3e   :  { %640 = vmatpush3.bf16.msra.mxu0 %v639_v33  ;;  %v390_v33 = vsub.s32 2, %v94_v11 }
  0x3f   :  { %641 = vmatprep.subr.bf16.mxu0 %v805_v0 }
  0x40   :  { %664 = vmatpush3.bf16.msra.mxu1 %v663_v42  ;;  %v391_v35 = vrot.slane %v92_v13, %v390_v33 }
  0x41   :  { %665 = vmatprep.subr.bf16.mxu1 %v805_v0 }
  0x42   :  { %643 = vmatpush3.bf16.msra.mxu0 %v642_v39 }
  0x43   :  { %644 = vmatprep.subr.bf16.mxu0 %v805_v0 }
  0x44   :  { %667 = vmatpush3.bf16.msra.mxu1 %v666_v46 }
  0x45   :  { %668 = vmatprep.subr.bf16.mxu1 %v805_v0 }
  0x46   :  { %646 = vmatpush3.bf16.msra.mxu0 %v645_v45 }
  0x47   :  { %671 = vmatprep.subr.bf16.mxu0 %v805_v0 }
  0x48   :  { %670 = vmatpush3.bf16.msra.mxu1 %v669_v50 }
  0x49   :  { %516 = vmatmul.mubr.f32.vlgmr.msra.gmra.mrb[0].mxu0 %v879_v47  ;;  %695 = vmatprep.subr.bf16.mxu1 %v805_v0 }
  0x4a   :  { %585 = vmatprep.mubr.msk.f32.mxu0 %vm806_vm0, %v807_v1  ;;  %673 = vmatpush3.bf16.msra.mxu0 %v672_v54 }
  0x4b   :  { %674 = vmatprep.subr.bf16.mxu0 %v805_v0 }
  0x4e   :  { %676 = vmatpush3.bf16.msra.mxu0 %v675_v56 }
  0x4f   :  { %677 = vmatprep.subr.bf16.mxu0 %v805_v0 }
  0x52   :  { %679 = vmatpush3.bf16.msra.mxu0 %v678_v59 }
  0x53   :  { %680 = vmatprep.subr.bf16.mxu0 %v805_v0 }
  0x56   :  { %682 = vmatpush3.bf16.msra.mxu0 %v681_v62 }
  0x57   :  { %683 = vmatprep.subr.bf16.mxu0 %v805_v0 }
  0x5a   :  { %685 = vmatpush3.bf16.msra.mxu0 %v684_v3 }
  0x5b   :  { %686 = vmatprep.subr.bf16.mxu0 %v805_v0 }
  0x5e   :  { %688 = vmatpush3.bf16.msra.mxu0 %v687_v6 }
  0x5f   :  { %689 = vmatprep.subr.bf16.mxu0 %v805_v0 }
  0x62   :  { %691 = vmatpush3.bf16.msra.mxu0 %v690_v9 }
  0x63   :  { %692 = vmatprep.subr.bf16.mxu0 %v805_v0 }
 0x11c   :  { %v163_v15 = vpop.f32.mrb[0].mxu0 }
 0x11d   :  { %v164_v16 = vadd.f32 %v163_v15, %v96_v14  ;;  %v517_v17 = vpop.f32.mrb[1].mxu0 }
 0x11f   :  { %v167_v18 = vmax.f32 %v164_v16, 0.0 }
 0x121   :  { %551 = vmatmul.mubr.f32.vlgmr.msra.gmra.mrb[0].mxu1 %v167_v18 }
 0x122   :  { %697 = vmatpush3.bf16.msra.mxu1 %v672_v54  ;;  %620 = vmatprep.mubr.msk.f32.mxu1 %vm806_vm0, %v807_v1  ;;  %v90_v1 = vld [vmem:[#allocation5 + $0x170] sm:$0xff] }
 0x123   :  { %698 = vmatprep.subr.bf16.mxu1 %v805_v0  ;;  %v693_v20 = vpack.c.bf16 %v91_v19, %v90_v1 }
 0x125   :  { %694 = vmatpush3.bf16.msra.mxu0 %v693_v20 }
 0x126   :  { %700 = vmatpush3.bf16.msra.mxu1 %v675_v56 }
 0x127   :  { %701 = vmatprep.subr.bf16.mxu1 %v805_v0 }
 0x12a   :  { %703 = vmatpush3.bf16.msra.mxu1 %v678_v59 }
 0x12b   :  { %704 = vmatprep.subr.bf16.mxu1 %v805_v0 }
 0x12e   :  { %706 = vmatpush3.bf16.msra.mxu1 %v681_v62 }
 0x12f   :  { %707 = vmatprep.subr.bf16.mxu1 %v805_v0 }
 0x132   :  { %709 = vmatpush3.bf16.msra.mxu1 %v684_v3 }
 0x133   :  { %710 = vmatprep.subr.bf16.mxu1 %v805_v0 }
 0x136   :  { %712 = vmatpush3.bf16.msra.mxu1 %v687_v6 }
 0x137   :  { %713 = vmatprep.subr.bf16.mxu1 %v805_v0 }
 0x13a   :  { %715 = vmatpush3.bf16.msra.mxu1 %v690_v9 }
 0x13b   :  { %716 = vmatprep.subr.bf16.mxu1 %v805_v0 }
 0x13e   :  { %718 = vmatpush3.bf16.msra.mxu1 %v693_v20 }
 0x1f4   :  { %v234_v23 = vpop.f32.mrb[0].mxu1 }
 0x1f5   :  { %v238_v24 = vadd.f32 %v234_v23, %v879_v47  ;;  %v552_v25 = vpop.f32.mrb[1].mxu1 }
 0x1f7   :  { %v243_v26 = vadd.f32 %v242_v22, %v238_v24 }
 0x1f9   :  { %586 = vmatmul.mubr.f32.vlgmr.msra.gmra.mrb[2].mxu0 %v243_v26 }
 0x2cc   :  { %v310_v27 = vpop.f32.mrb[2].mxu0 }
 0x2cd   :  { %v314_v28 = vsub.f32 %v243_v26, %v310_v27  ;;  %v587_v29 = vpop.f32.mrb[3].mxu0 }
 0x2cf   :  { %v315_v30 = vmul.f32 %v314_v28, %v314_v28 }
 0x2d1   :  { %621 = vmatmul.mubr.f32.vlgmr.msra.gmra.mrb[2].mxu1 %v315_v30 }
 0x3a4   :  { %v382_v31 = vpop.f32.mrb[2].mxu1 }
 0x3a5   :  { %v383_v0 = vadd.f32 1e-05, %v382_v31  ;;  %v622_v32 = vpop.f32.mrb[3].mxu1 }
 0x3a7   :  { %727 = vrsqrt.f32 %v383_v0 }
 0x3b1   :  { %v728_v36 = vpop.eup %727 }
 0x3b2   :  { %v387_v37 = vmul.f32 %v728_v36, %v314_v28 }
 0x3b4   :  { %v392_v39 = vmul.f32 %v391_v35, %v387_v37 }
 0x3b6   :  { %v397_v40 = vadd.f32 %v396_v38, %v392_v39 }
 0x3b8   :  { %398 = vst [vmem:[#allocation7] sm:$0xff] %v397_v40 }
 0x3b9   :  { %784 = shalt.err (!%p781_p6)
}
 0x3ba   :  { %s785_s15 = scalar_lea.hbm %s922_s3, 128 }
 0x3bb   :  { %p786_p7 = scmp.ne.s32.totalorder %s922_s3, %s785_s15  ;;  %p789_p8 = scmp.lt.u32.totalorder %s785_s15, %s922_s3 }
 0x3bd   :  { %p791_p9 = pnand %p789_p8, %p786_p7 }
 0x3bf   :  { %794 = shalt.err (!%p791_p9)
}
 0x3c0   :  { %408 = dma.vmem_to_hbm [thread:$0]  %s406_s11, 128, %s922_s3, [#allocation4]  }
 0x3c1   :  { %799 = dma.done.wait [#allocation4], 128  }
 0x3c2   :  { %800 = vsyncadd [#allocation4], 4294967168 }
 0x3c3   :  { %412 = vsyncpa [#allocation3], 1 }
 0x3c4   :  { %413 = vsyncpa [#allocation6], 1 }
 0x3c5   :  { %414 = vsyncpa [#allocation4], 1 }

</bundles_post_ra>
